<compile_context>
chip_gen: v5e
topology: v5e:2x2
jax: 0.10.0
libtpu: 0.0.40
codegen_flags: <defaults>
</compile_context>

<pallas_src>
import functools

import jax
import jax.numpy as jnp
import numpy as np
from jax.experimental import pallas as pl
from jax.experimental.pallas import tpu as pltpu


def _round_up(a: int, b: int) -> int:
    return (a + b - 1) // b * b


def _chip_vmem_plan():
    """Generation-aware VMEM working-set budget, scoped limit, and whether to
    keep >= 2 grid steps so the batch axis can shard across TensorCores."""
    try:
        phys = getattr(pltpu.get_tpu_info(), "vmem_capacity_bytes", None)
    except Exception:  # query unavailable -> conservative defaults
        phys = None
    if phys is None or phys <= 64 * 1024 * 1024:
        # v7x-class: 64 MiB physical VMEM, 2 TensorCores per chip.
        return {"budget": 28 << 20, "limit": 48 << 20, "multi_core": True}
    # v5e / v6e: 128 MiB physical VMEM, single TensorCore.
    return {"budget": 56 << 20, "limit": 96 << 20, "multi_core": False}


def _xcorr_kernel(scale_ref, z_ref, x_ref, o_ref, r_ref, *, offsets, mo_p):
    """One grid step processes block_n images.

    scale_ref: SMEM (1,)               f32   exp(log_scale)
    z_ref:     VMEM (Bn, Taps, Cp)     compute dtype (taps-major template)
    x_ref:     VMEM (Bn, Cp, Lp)       compute dtype (lane-flat raw image)
    o_ref:     VMEM (Bn, 1, Mo_p)      f32   lane-flat response rows
    r_ref:     VMEM (Bn, Taps, Lp)     f32   scratch: per-tap channel sums
    """
    # Entire C-reduction on the MXU with f32 accumulation:
    #   R[b, r, l] = sum_c z[b, r, c] * xflat[b, c, l]
    r_ref[...] = jax.lax.dot_general(
        z_ref[...], x_ref[...],
        dimension_numbers=(((2,), (1,)), ((0,), (0,))),
        preferred_element_type=jnp.float32)

    # Fold the Hz*Wz taps with static lane offsets (tiny f32 slabs):
    #   out[b, i*Wx + j] = sum_r R[b, r, i*Wx + j + off_r]
    bn = o_ref.shape[0]
    acc = jnp.zeros((bn, 1, mo_p), jnp.float32)
    for r, off in enumerate(offsets):
        acc = acc + r_ref[:, r:r + 1, off:off + mo_p]
    o_ref[...] = acc * scale_ref[0]


def xcorr(z, x, scale_param, *, compute_dtype=jnp.bfloat16, block_n=None):
    """Pallas implementation of XCorr.forward (Tensor branch).

    scale_param: (1,) log-scale parameter (matches nn.Parameter(scale.log())).
    """
    N, C, Hz, Wz = z.shape
    Nx, Cx, Hx, Wx = x.shape
    assert N == Nx and C == Cx
    assert Hz <= Hx and Wz <= Wx, "template must not exceed search image"
    Ho, Wo = Hx - Hz + 1, Wx - Wz + 1

    n_taps = Hz * Wz
    itemsize = jnp.dtype(compute_dtype).itemsize
    Cp = _round_up(C, 16 if itemsize < 4 else 8)   # sublane-friendly channels

    Mo = Ho * Wx                                   # valid lane-flat out length
    Mo_p = _round_up(Mo, 128)                      # lane-dense output block
    off_max = (Hz - 1) * Wx + (Wz - 1)
    Lp = _round_up(off_max + Mo_p, 128)            # >= Hx*Wx, room for shifts
    offsets = tuple(di * Wx + dj for di in range(Hz) for dj in range(Wz))

    plan = _chip_vmem_plan()
    if block_n is None:
        # Double-buffered in/out blocks + single-buffered f32 scratch.
        per_img = (2 * ((Cp * Lp + n_taps * Cp) * itemsize + Mo_p * 4)
                   + n_taps * Lp * 4)
        block_n = max(1, int(plan["budget"] // per_img))
        block_n = min(block_n, N)
        if plan["multi_core"] and N >= 2:
            # Keep >= 2 grid steps only on dual-TensorCore chips so the
            # "parallel" batch axis shards across both cores.
            block_n = min(block_n, (N + 1) // 2)
    steps = pl.cdiv(N, block_n)
    block_n = pl.cdiv(N, steps)        # shrink block to minimize padded images
    Np = steps * block_n

    # Cast to compute dtype BEFORE padding/reshaping: wrapper HBM traffic stays
    # at raw-input size (no f32-sized intermediates, no im2col inflation).
    x_flat = x.astype(compute_dtype).reshape(N, C, Hx * Wx)
    x_flat = jnp.pad(x_flat, ((0, Np - N), (0, Cp - C), (0, Lp - Hx * Wx)))

    z_taps = z.astype(compute_dtype).transpose(0, 2, 3, 1).reshape(N, n_taps, C)
    z_taps = jnp.pad(z_taps, ((0, Np - N), (0, 0), (0, Cp - C)))

    scale = jnp.exp(scale_param).astype(jnp.float32)        # (1,)

    kernel = functools.partial(_xcorr_kernel, offsets=offsets, mo_p=Mo_p)

    out = pl.pallas_call(
        kernel,
        out_shape=jax.ShapeDtypeStruct((Np, 1, Mo_p), jnp.float32),
        grid=(steps,),
        in_specs=[
            pl.BlockSpec(memory_space=pltpu.MemorySpace.SMEM),         # scale
            pl.BlockSpec((block_n, n_taps, Cp), lambda g: (g, 0, 0)),  # z
            # NOTE: if profiling on v5e/v6e shows exposed DMA ramp-up, add
            # pipeline_mode=pl.Buffered(3) here (skip on v7x: 64 MiB VMEM).
            pl.BlockSpec((block_n, Cp, Lp), lambda g: (g, 0, 0)),      # x
        ],
        out_specs=pl.BlockSpec((block_n, 1, Mo_p), lambda g: (g, 0, 0)),
        scratch_shapes=[pltpu.VMEM((block_n, n_taps, Lp), jnp.float32)],
        compiler_params=pltpu.CompilerParams(
            dimension_semantics=("parallel",),
            vmem_limit_bytes=plan["limit"]),
    )(scale, z_taps, x_flat)

    # Un-pad: keep the valid Wo columns of each lane-flat row, restore NCHW.
    out = out[:N, 0, :Mo].reshape(N, Ho, Wx)[:, :, :Wo]
    return out[:, None, :, :]


def _reference_xcorr_f64(z, x, scale_param):
    """Exact float64 numpy reference of XCorr.forward (Tensor branch)."""
    z64 = np.asarray(z, dtype=np.float64)
    x64 = np.asarray(x, dtype=np.float64)
    n, c, hz, wz = z64.shape
    _, _, hx, wx = x64.shape
    ho, wo = hx - hz + 1, wx - wz + 1
    out = np.zeros((n, 1, ho, wo), dtype=np.float64)
    for i in range(ho):
        for j in range(wo):
            win = x64[:, :, i:i + hz, j:j + wz]
            out[:, 0, i, j] = np.einsum("nchw,nchw->n", z64, win)
    return np.exp(np.asarray(scale_param, np.float64))[0] * out


if __name__ == "__main__":
    key = jax.random.PRNGKey(0)
    kz, kx = jax.random.split(key)

    N, C = 2, 4
    Hx = Wx = 16
    Hz = Wz = 6

    z = jax.random.normal(kz, (N, C, Hz, Wz), dtype=jnp.float32)
    x = jax.random.normal(kx, (N, C, Hx, Wx), dtype=jnp.float32)

    # Deterministic parameter init, matching XCorr(scale=0.001):
    #   self.scale = nn.Parameter(torch.Tensor([0.001]).log())
    scale_param = jnp.log(jnp.array([0.001], dtype=jnp.float32))

    ref = _reference_xcorr_f64(z, x, scale_param)

    xcorr_jit = jax.jit(xcorr, static_argnames=("compute_dtype", "block_n"))

    # Full-width f32 inputs (tighter tolerance than the bf16 path).
    out_f32 = jax.block_until_ready(
        xcorr_jit(z, x, scale_param, compute_dtype=jnp.float32))
    np.testing.assert_allclose(np.asarray(out_f32), ref, rtol=5e-3, atol=2e-4)

    # Default fast path: bf16 inputs on the MXU, f32 accumulation.
    out_bf16 = jax.block_until_ready(xcorr_jit(z, x, scale_param))
    np.testing.assert_allclose(np.asarray(out_bf16), ref, rtol=5e-2, atol=1e-3)

    assert out_bf16.shape == (N, 1, Hx - Hz + 1, Wx - Wz + 1)
    print("KERNEL_OK")
</pallas_src>

<mosaic_0001>
module attributes {stable_mosaic.version = 11 : i64} {
  func.func @_xcorr_kernel(%arg0: i32, %arg1: memref<1xf32, #tpu.memory_space<smem>>, %arg2: memref<1x36x8xf32, #tpu.memory_space<vmem>>, %arg3: memref<1x8x384xf32, #tpu.memory_space<vmem>>, %arg4: memref<1x1x256xf32, #tpu.memory_space<vmem>>, %arg5: memref<1x36x384xf32, #tpu.memory_space<vmem>>) attributes {dimension_semantics = [#tpu.dimension_semantics<parallel>], iteration_bounds = array<i64: 2>, scalar_prefetch = 0 : i64, scratch_operands = 1 : i64, tpu.core_type = #tpu.core_type<tc>, window_params = [{transform_indices = @transform_0, window_bounds = array<i64: 1>}, {transform_indices = @transform_1, window_bounds = array<i64: 1, 36, 8>}, {transform_indices = @transform_2, window_bounds = array<i64: 1, 8, 384>}, {transform_indices = @transform_3, window_bounds = array<i64: 1, 1, 256>}]} {
    %c0 = arith.constant 0 : index
    %c0_0 = arith.constant 0 : index
    %c0_1 = arith.constant 0 : index
    %0 = vector.load %arg2[%c0, %c0_0, %c0_1] : memref<1x36x8xf32, #tpu.memory_space<vmem>>, vector<1x36x8xf32>
    %c0_2 = arith.constant 0 : index
    %c0_3 = arith.constant 0 : index
    %c0_4 = arith.constant 0 : index
    %1 = vector.load %arg3[%c0_2, %c0_3, %c0_4] : memref<1x8x384xf32, #tpu.memory_space<vmem>>, vector<1x8x384xf32>
    %cst = arith.constant dense<0.000000e+00> : vector<1x36x384xf32>
    %2 = tpu.matmul %0, %1, %cst {dimension_numbers = #tpu.dot_dimension_numbers<[2], [1], [1], [2], [0, 0, 0, 1, 1, 2], [0], [0]>} : vector<1x36x8xf32>, vector<1x8x384xf32>, vector<1x36x384xf32> -> vector<1x36x384xf32>
    %c0_5 = arith.constant 0 : index
    %c0_6 = arith.constant 0 : index
    %c0_7 = arith.constant 0 : index
    %3 = vector.load %arg5[%c0_5, %c0_6, %c0_7] : memref<1x36x384xf32, #tpu.memory_space<vmem>>, vector<1x36x384xf32>
    tpu.vector_store %arg5[%c0_5, %c0_6, %c0_7], %2 {strides = array<i32>} : memref<1x36x384xf32, #tpu.memory_space<vmem>>, vector<1x36x384xf32>,
    %cst_8 = arith.constant 0.000000e+00 : f32
    %4 = vector.broadcast %cst_8 : f32 to vector<1x1x256xf32>
    %c0_9 = arith.constant 0 : index
    %c0_10 = arith.constant 0 : index
    %c0_11 = arith.constant 0 : index
    %5 = vector.load %arg5[%c0_9, %c0_10, %c0_11] : memref<1x36x384xf32, #tpu.memory_space<vmem>>, vector<1x1x256xf32>
    %6 = arith.addf %4, %5 : vector<1x1x256xf32>
    %c0_12 = arith.constant 0 : index
    %c1 = arith.constant 1 : index
    %c1_13 = arith.constant 1 : index
    %7 = vector.load %arg5[%c0_12, %c1, %c1_13] : memref<1x36x384xf32, #tpu.memory_space<vmem>>, vector<1x1x256xf32>
    %8 = arith.addf %6, %7 : vector<1x1x256xf32>
    %c0_14 = arith.constant 0 : index
    %c2 = arith.constant 2 : index
    %c2_15 = arith.constant 2 : index
    %9 = vector.load %arg5[%c0_14, %c2, %c2_15] : memref<1x36x384xf32, #tpu.memory_space<vmem>>, vector<1x1x256xf32>
    %10 = arith.addf %8, %9 : vector<1x1x256xf32>
    %c0_16 = arith.constant 0 : index
    %c3 = arith.constant 3 : index
    %c3_17 = arith.constant 3 : index
    %11 = vector.load %arg5[%c0_16, %c3, %c3_17] : memref<1x36x384xf32, #tpu.memory_space<vmem>>, vector<1x1x256xf32>
    %12 = arith.addf %10, %11 : vector<1x1x256xf32>
    %c0_18 = arith.constant 0 : index
    %c4 = arith.constant 4 : index
    %c4_19 = arith.constant 4 : index
    %13 = vector.load %arg5[%c0_18, %c4, %c4_19] : memref<1x36x384xf32, #tpu.memory_space<vmem>>, vector<1x1x256xf32>
    %14 = arith.addf %12, %13 : vector<1x1x256xf32>
    %c0_20 = arith.constant 0 : index
    %c5 = arith.constant 5 : index
    %c5_21 = arith.constant 5 : index
    %15 = vector.load %arg5[%c0_20, %c5, %c5_21] : memref<1x36x384xf32, #tpu.memory_space<vmem>>, vector<1x1x256xf32>
    %16 = arith.addf %14, %15 : vector<1x1x256xf32>
    %c0_22 = arith.constant 0 : index
    %c6 = arith.constant 6 : index
    %c16 = arith.constant 16 : index
    %17 = vector.load %arg5[%c0_22, %c6, %c16] : memref<1x36x384xf32, #tpu.memory_space<vmem>>, vector<1x1x256xf32>
    %18 = arith.addf %16, %17 : vector<1x1x256xf32>
    %c0_23 = arith.constant 0 : index
    %c7 = arith.constant 7 : index
    %c17 = arith.constant 17 : index
    %19 = vector.load %arg5[%c0_23, %c7, %c17] : memref<1x36x384xf32, #tpu.memory_space<vmem>>, vector<1x1x256xf32>
    %20 = arith.addf %18, %19 : vector<1x1x256xf32>
    %c0_24 = arith.constant 0 : index
    %c8 = arith.constant 8 : index
    %c18 = arith.constant 18 : index
    %21 = vector.load %arg5[%c0_24, %c8, %c18] : memref<1x36x384xf32, #tpu.memory_space<vmem>>, vector<1x1x256xf32>
    %22 = arith.addf %20, %21 : vector<1x1x256xf32>
    %c0_25 = arith.constant 0 : index
    %c9 = arith.constant 9 : index
    %c19 = arith.constant 19 : index
    %23 = vector.load %arg5[%c0_25, %c9, %c19] : memref<1x36x384xf32, #tpu.memory_space<vmem>>, vector<1x1x256xf32>
    %24 = arith.addf %22, %23 : vector<1x1x256xf32>
    %c0_26 = arith.constant 0 : index
    %c10 = arith.constant 10 : index
    %c20 = arith.constant 20 : index
    %25 = vector.load %arg5[%c0_26, %c10, %c20] : memref<1x36x384xf32, #tpu.memory_space<vmem>>, vector<1x1x256xf32>
    %26 = arith.addf %24, %25 : vector<1x1x256xf32>
    %c0_27 = arith.constant 0 : index
    %c11 = arith.constant 11 : index
    %c21 = arith.constant 21 : index
    %27 = vector.load %arg5[%c0_27, %c11, %c21] : memref<1x36x384xf32, #tpu.memory_space<vmem>>, vector<1x1x256xf32>
    %28 = arith.addf %26, %27 : vector<1x1x256xf32>
    %c0_28 = arith.constant 0 : index
    %c12 = arith.constant 12 : index
    %c32 = arith.constant 32 : index
    %29 = vector.load %arg5[%c0_28, %c12, %c32] : memref<1x36x384xf32, #tpu.memory_space<vmem>>, vector<1x1x256xf32>
    %30 = arith.addf %28, %29 : vector<1x1x256xf32>
    %c0_29 = arith.constant 0 : index
    %c13 = arith.constant 13 : index
    %c33 = arith.constant 33 : index
    %31 = vector.load %arg5[%c0_29, %c13, %c33] : memref<1x36x384xf32, #tpu.memory_space<vmem>>, vector<1x1x256xf32>
    %32 = arith.addf %30, %31 : vector<1x1x256xf32>
    %c0_30 = arith.constant 0 : index
    %c14 = arith.constant 14 : index
    %c34 = arith.constant 34 : index
    %33 = vector.load %arg5[%c0_30, %c14, %c34] : memref<1x36x384xf32, #tpu.memory_space<vmem>>, vector<1x1x256xf32>
    %34 = arith.addf %32, %33 : vector<1x1x256xf32>
    %c0_31 = arith.constant 0 : index
    %c15 = arith.constant 15 : index
    %c35 = arith.constant 35 : index
    %35 = vector.load %arg5[%c0_31, %c15, %c35] : memref<1x36x384xf32, #tpu.memory_space<vmem>>, vector<1x1x256xf32>
    %36 = arith.addf %34, %35 : vector<1x1x256xf32>
    %c0_32 = arith.constant 0 : index
    %c16_33 = arith.constant 16 : index
    %c36 = arith.constant 36 : index
    %37 = vector.load %arg5[%c0_32, %c16_33, %c36] : memref<1x36x384xf32, #tpu.memory_space<vmem>>, vector<1x1x256xf32>
    %38 = arith.addf %36, %37 : vector<1x1x256xf32>
    %c0_34 = arith.constant 0 : index
    %c17_35 = arith.constant 17 : index
    %c37 = arith.constant 37 : index
    %39 = vector.load %arg5[%c0_34, %c17_35, %c37] : memref<1x36x384xf32, #tpu.memory_space<vmem>>, vector<1x1x256xf32>
    %40 = arith.addf %38, %39 : vector<1x1x256xf32>
    %c0_36 = arith.constant 0 : index
    %c18_37 = arith.constant 18 : index
    %c48 = arith.constant 48 : index
    %41 = vector.load %arg5[%c0_36, %c18_37, %c48] : memref<1x36x384xf32, #tpu.memory_space<vmem>>, vector<1x1x256xf32>
    %42 = arith.addf %40, %41 : vector<1x1x256xf32>
    %c0_38 = arith.constant 0 : index
    %c19_39 = arith.constant 19 : index
    %c49 = arith.constant 49 : index
    %43 = vector.load %arg5[%c0_38, %c19_39, %c49] : memref<1x36x384xf32, #tpu.memory_space<vmem>>, vector<1x1x256xf32>
    %44 = arith.addf %42, %43 : vector<1x1x256xf32>
    %c0_40 = arith.constant 0 : index
    %c20_41 = arith.constant 20 : index
    %c50 = arith.constant 50 : index
    %45 = vector.load %arg5[%c0_40, %c20_41, %c50] : memref<1x36x384xf32, #tpu.memory_space<vmem>>, vector<1x1x256xf32>
    %46 = arith.addf %44, %45 : vector<1x1x256xf32>
    %c0_42 = arith.constant 0 : index
    %c21_43 = arith.constant 21 : index
    %c51 = arith.constant 51 : index
    %47 = vector.load %arg5[%c0_42, %c21_43, %c51] : memref<1x36x384xf32, #tpu.memory_space<vmem>>, vector<1x1x256xf32>
    %48 = arith.addf %46, %47 : vector<1x1x256xf32>
    %c0_44 = arith.constant 0 : index
    %c22 = arith.constant 22 : index
    %c52 = arith.constant 52 : index
    %49 = vector.load %arg5[%c0_44, %c22, %c52] : memref<1x36x384xf32, #tpu.memory_space<vmem>>, vector<1x1x256xf32>
    %50 = arith.addf %48, %49 : vector<1x1x256xf32>
    %c0_45 = arith.constant 0 : index
    %c23 = arith.constant 23 : index
    %c53 = arith.constant 53 : index
    %51 = vector.load %arg5[%c0_45, %c23, %c53] : memref<1x36x384xf32, #tpu.memory_space<vmem>>, vector<1x1x256xf32>
    %52 = arith.addf %50, %51 : vector<1x1x256xf32>
    %c0_46 = arith.constant 0 : index
    %c24 = arith.constant 24 : index
    %c64 = arith.constant 64 : index
    %53 = vector.load %arg5[%c0_46, %c24, %c64] : memref<1x36x384xf32, #tpu.memory_space<vmem>>, vector<1x1x256xf32>
    %54 = arith.addf %52, %53 : vector<1x1x256xf32>
    %c0_47 = arith.constant 0 : index
    %c25 = arith.constant 25 : index
    %c65 = arith.constant 65 : index
    %55 = vector.load %arg5[%c0_47, %c25, %c65] : memref<1x36x384xf32, #tpu.memory_space<vmem>>, vector<1x1x256xf32>
    %56 = arith.addf %54, %55 : vector<1x1x256xf32>
    %c0_48 = arith.constant 0 : index
    %c26 = arith.constant 26 : index
    %c66 = arith.constant 66 : index
    %57 = vector.load %arg5[%c0_48, %c26, %c66] : memref<1x36x384xf32, #tpu.memory_space<vmem>>, vector<1x1x256xf32>
    %58 = arith.addf %56, %57 : vector<1x1x256xf32>
    %c0_49 = arith.constant 0 : index
    %c27 = arith.constant 27 : index
    %c67 = arith.constant 67 : index
    %59 = vector.load %arg5[%c0_49, %c27, %c67] : memref<1x36x384xf32, #tpu.memory_space<vmem>>, vector<1x1x256xf32>
    %60 = arith.addf %58, %59 : vector<1x1x256xf32>
    %c0_50 = arith.constant 0 : index
    %c28 = arith.constant 28 : index
    %c68 = arith.constant 68 : index
    %61 = vector.load %arg5[%c0_50, %c28, %c68] : memref<1x36x384xf32, #tpu.memory_space<vmem>>, vector<1x1x256xf32>
    %62 = arith.addf %60, %61 : vector<1x1x256xf32>
    %c0_51 = arith.constant 0 : index
    %c29 = arith.constant 29 : index
    %c69 = arith.constant 69 : index
    %63 = vector.load %arg5[%c0_51, %c29, %c69] : memref<1x36x384xf32, #tpu.memory_space<vmem>>, vector<1x1x256xf32>
    %64 = arith.addf %62, %63 : vector<1x1x256xf32>
    %c0_52 = arith.constant 0 : index
    %c30 = arith.constant 30 : index
    %c80 = arith.constant 80 : index
    %65 = vector.load %arg5[%c0_52, %c30, %c80] : memref<1x36x384xf32, #tpu.memory_space<vmem>>, vector<1x1x256xf32>
    %66 = arith.addf %64, %65 : vector<1x1x256xf32>
    %c0_53 = arith.constant 0 : index
    %c31 = arith.constant 31 : index
    %c81 = arith.constant 81 : index
    %67 = vector.load %arg5[%c0_53, %c31, %c81] : memref<1x36x384xf32, #tpu.memory_space<vmem>>, vector<1x1x256xf32>
    %68 = arith.addf %66, %67 : vector<1x1x256xf32>
    %c0_54 = arith.constant 0 : index
    %c32_55 = arith.constant 32 : index
    %c82 = arith.constant 82 : index
    %69 = vector.load %arg5[%c0_54, %c32_55, %c82] : memref<1x36x384xf32, #tpu.memory_space<vmem>>, vector<1x1x256xf32>
    %70 = arith.addf %68, %69 : vector<1x1x256xf32>
    %c0_56 = arith.constant 0 : index
    %c33_57 = arith.constant 33 : index
    %c83 = arith.constant 83 : index
    %71 = vector.load %arg5[%c0_56, %c33_57, %c83] : memref<1x36x384xf32, #tpu.memory_space<vmem>>, vector<1x1x256xf32>
    %72 = arith.addf %70, %71 : vector<1x1x256xf32>
    %c0_58 = arith.constant 0 : index
    %c34_59 = arith.constant 34 : index
    %c84 = arith.constant 84 : index
    %73 = vector.load %arg5[%c0_58, %c34_59, %c84] : memref<1x36x384xf32, #tpu.memory_space<vmem>>, vector<1x1x256xf32>
    %74 = arith.addf %72, %73 : vector<1x1x256xf32>
    %c0_60 = arith.constant 0 : index
    %c35_61 = arith.constant 35 : index
    %c85 = arith.constant 85 : index
    %75 = vector.load %arg5[%c0_60, %c35_61, %c85] : memref<1x36x384xf32, #tpu.memory_space<vmem>>, vector<1x1x256xf32>
    %76 = arith.addf %74, %75 : vector<1x1x256xf32>
    %c0_62 = arith.constant 0 : index
    %77 = memref.load %arg1[%c0_62] : memref<1xf32, #tpu.memory_space<smem>>
    %78 = vector.broadcast %77 : f32 to vector<1x1x256xf32>
    %79 = arith.mulf %76, %78 : vector<1x1x256xf32>
    %c0_63 = arith.constant 0 : index
    %c0_64 = arith.constant 0 : index
    %c0_65 = arith.constant 0 : index
    %80 = vector.load %arg4[%c0_63, %c0_64, %c0_65] : memref<1x1x256xf32, #tpu.memory_space<vmem>>, vector<1x1x256xf32>
    tpu.vector_store %arg4[%c0_63, %c0_64, %c0_65], %79 {strides = array<i32>} : memref<1x1x256xf32, #tpu.memory_space<vmem>>, vector<1x1x256xf32>,
    return
  }
  func.func @transform_0(%arg0: i32) -> i32 {
    %c0_i32 = arith.constant 0 : i32
    %c0_i32_0 = arith.constant 0 : i32
    return %c0_i32 : i32
  }
  func.func @transform_1(%arg0: i32) -> (i32, i32, i32) {
    %c0_i32 = arith.constant 0 : i32
    %c0_i32_0 = arith.constant 0 : i32
    %c0_i32_1 = arith.constant 0 : i32
    return %arg0, %c0_i32, %c0_i32_0 : i32, i32, i32
  }
  func.func @transform_2(%arg0: i32) -> (i32, i32, i32) {
    %c0_i32 = arith.constant 0 : i32
    %c0_i32_0 = arith.constant 0 : i32
    %c0_i32_1 = arith.constant 0 : i32
    return %arg0, %c0_i32, %c0_i32_0 : i32, i32, i32
  }
  func.func @transform_3(%arg0: i32) -> (i32, i32, i32) {
    %c0_i32 = arith.constant 0 : i32
    %c0_i32_0 = arith.constant 0 : i32
    %c0_i32_1 = arith.constant 0 : i32
    return %arg0, %c0_i32, %c0_i32_0 : i32, i32, i32
  }
}

</mosaic_0001>

<bundles_post_ra>
// kernel: squeeze.1
= control target key start
LH: loop header
LB: loop body
LE: loop exit
PB: predicated region body
PF: predicated region fallthrough
CT: control target
= control target key end

     0   :  { %vm11_vm0 = vcmask 130048   ;;  %s76_s11 = smov 112   ;;  %s77_s12 = smov 80   ;;  %s135_s0 = inlined_call_operand.vmem [shape: f32[2,176], index: 0, kind: input, shape index: {}]   ;;  %s136_s1 = inlined_call_operand.vmem [shape: f32[2,11,16], index: 1, kind: output, shape index: {}]  }
   0x1   :  { %v60_v0 = vld [vmem:[%s135_s0 + $0x2] sm:$0x3]  ;;  %v8_v1 = vld [vmem:[%s135_s0] sm:$0x3]  ;;  %s78_s13 = smov 48   ;;  %s79_s16 = smov 96  }
   0x2   :  { %7 = vst [vmem:[#allocation0 + $0x8] sm:$0x3] %v60_v0  ;;  %s80_s17 = smov 64   ;;  %s81_s18 = smov 32  }
   0x3   :  { %9 = vst [vmem:[#allocation0] sm:$0x3] %v8_v1  ;;  %s82_s19 = smov 16  }
   0x9   :  { %v14_v2 = vld [vmem:[#allocation0 + $0x8] sm:$0x3]  }
   0xa   :  { %v18_v3 = vld.sshfl [vmem:[#allocation0] sm:$0xff pattern:$0x99999180]   ;;  %61 = vst.msk [vmem:[%s136_s1 + $0x8] ss:$16 sm:$0x3] %vm11_vm0, %v14_v2  }
   0xb   :  { %19 = vrot.lane.b32.xlu0 %v18_v3, %s76_s11  ;;  %v30_v4 = vld [vmem:[#allocation0] sm:$0x3]  }
   0xc   :  { %31 = vrot.lane.b32.xlu1 %v30_v4, %s77_s12  ;;  %v42_v5 = vld [vmem:[#allocation0] sm:$0x3]  }
   0xd   :  { %v10_v6 = vld [vmem:[#allocation0] sm:$0x3]   ;;  %43 = vrot.lane.b32.xlu2 %v42_v5, %s78_s13 }
   0xe   :  { %12 = vst.msk [vmem:[%s136_s1] ss:$16 sm:$0x3] %vm11_vm0, %v10_v6   ;;  %v36_v7 = vld [vmem:[#allocation0] sm:$0x3]  }
   0xf   :  { %v48_v8 = vld [vmem:[#allocation0] sm:$0x3]  }
  0x10   :  { %v54_v9 = vld [vmem:[#allocation0] sm:$0x3]  }
  0x13   :  { %25 = vrot.lane.b32.xlu0 %v18_v3, %s79_s16 }
  0x14   :  { %37 = vrot.lane.b32.xlu1 %v36_v7, %s80_s17 }
  0x15   :  { %49 = vrot.lane.b32.xlu2 %v48_v8, %s81_s18 }
  0x1b   :  { %55 = vrot.lane.b32.xlu0 %v54_v9, %s82_s19 }
  0x67   :  { %v44_v10 = vpop.permute.xlu2 %43  }
  0x68   :  { %66 = vst.msk [vmem:[%s136_s1 + $0x5] ss:$16 sm:$0x3] %vm11_vm0, %v44_v10  }
  0x6f   :  { %v50_v11 = vpop.permute.xlu2 %49  }
  0x70   :  { %67 = vst.msk [vmem:[%s136_s1 + $0x6] ss:$16 sm:$0x3] %vm11_vm0, %v50_v11  }
  0x7d   :  { %v20_v12 = vpop.permute.xlu0 %19  }
  0x7e   :  { %62 = vst.msk [vmem:[%s136_s1 + $0x1] ss:$8 sm:$0xf] %vm11_vm0, %v20_v12   ;;  %v32_v13 = vpop.permute.xlu1 %31  }
  0x7f   :  { %64 = vst.msk [vmem:[%s136_s1 + $0x3] ss:$16 sm:$0x3] %vm11_vm0, %v32_v13  }
  0x85   :  { %v26_v14 = vpop.permute.xlu0 %25  }
  0x86   :  { %63 = vst.msk [vmem:[%s136_s1 + $0x2] ss:$8 sm:$0xf] %vm11_vm0, %v26_v14   ;;  %v38_v15 = vpop.permute.xlu1 %37  }
  0x87   :  { %65 = vst.msk [vmem:[%s136_s1 + $0x4] ss:$16 sm:$0x3] %vm11_vm0, %v38_v15  }
  0x8d   :  { %v56_v16 = vpop.permute.xlu0 %55  }
  0x8e   :  { %68 = vst.msk [vmem:[%s136_s1 + $0x7] ss:$16 sm:$0x3] %vm11_vm0, %v56_v16  }

// kernel: xcorr.1
= control target key start
LH: loop header
LB: loop body
LE: loop exit
PB: predicated region body
PF: predicated region fallthrough
CT: control target
= control target key end

     0   :  { %s889_s14 = smov 0   ;;  %s945_s0 = inlined_call_operand.<no memory space> [shape: f32[1], index: 0, kind: input, shape index: {}]   ;;  %s946_s1 = inlined_call_operand.vmem [shape: f32[2,36,8], index: 1, kind: input, shape index: {}]   ;;  %s947_s2 = inlined_call_operand.vmem [shape: f32[2,8,384], index: 2, kind: input, shape index: {}]   ;;  %s948_s3 = inlined_call_operand.vmem [shape: f32[2,1,256], index: 3, kind: output, shape index: {}]  }
   0x1   :  { %8 = sst [smem:[#allocation3]] %s945_s0 }
   0x2 LB: > { %s750_s15 = sadd.s32 4294967295, %s829_s14   ;;  %p754_p0 = scmp.ge.s32.totalorder %s829_s14, 1  ;;  %s829_s14 = sphi %s889_s14, %s14_s14  }
   0x3   : > { %p148_p1 = scmp.lt.s32.totalorder %s829_s14, 3 }
   0x5   : > { %p149_p2 = pnand %p754_p0, %p148_p1 }
   0x6   : > { %p176_p3 = scmp.lt.s32.totalorder (!%p149_p2), %s750_s15, 1  ;;  %s831_s23 = smov (!%p149_p2), 108  }
   0x7   : > { %152 = sbr.rel (%p149_p2) target bundleno = 373 (0x175), region = 32  ;;  %s832_s24 = smov (!%p149_p2), 109  }
   0x8   : > { %s833_s25 = smov (!%p149_p2), 110   ;;  %s834_s26 = smov (!%p149_p2), 95  }
   0x9   : > { %s835_s27 = smov (!%p149_p2), 96   ;;  %s836_s28 = smov (!%p149_p2), 107  }
   0xa   : > { %s837_s29 = smov (!%p149_p2), 123   ;;  %s838_s30 = smov (!%p149_p2), 127  }
   0xb   : > { %s839_s4 = smov (!%p149_p2), 125   ;;  %s840_s5 = smov (!%p149_p2), 112  }
   0xc   : > { %s950_s15 = smov (!%p176_p3, %s750_s15), 1  ;;  %vm198_vm0 = vcmask 64512   ;;  %s841_s6 = smov 126   ;;  %vm333_vm1 = vcmask 1039360   ;;  %vm343_vm2 = vcmask 1031168   ;;  %vm353_vm3 = vcmask 1022976  }
   0xd   : > { %s779_s0 = smul.u32 24, %s950_s15  ;;  %s842_s7 = smov 124   ;;  %vm363_vm4 = vcmask 1014784   ;;  %vm373_vm5 = vcmask 1006592   ;;  %vm383_vm6 = vcmask 916480   ;;  %vm393_vm7 = vcmask 908288  }
   0xe   : > { %s778_s16 = smul.u32 40, %s950_s15  ;;  %s843_s8 = smov 93   ;;  %vm403_vm8 = vcmask 900096   ;;  %vm413_vm9 = vcmask 891904   ;;  %vm423_vm10 = vcmask 883712   ;;  %vm433_vm11 = vcmask 875520  }
   0xf   : > { %s185_s19 = scalar_lea.vmem %s947_s2, %s779_s0  ;;  %s844_s9 = smov 111   ;;  %vm443_vm12 = vcmask 785408   ;;  %vm453_vm13 = vcmask 777216   ;;  %vm463_vm14 = vcmask 769024   ;;  %vm473_vm15 = vcmask 760832  }
  0x10   : > { %v195_v0 = vld [vmem:[%s185_s19] sm:$0xff]  ;;  %v197_v1 = vld [vmem:[%s185_s19 + $0x10] sm:$0xff]  ;;  %s180_s22 = scalar_lea.vmem %s946_s1, %s778_s16  ;;  %v196_v4 = vld [vmem:[%s185_s19 + $0x8] sm:$0xff]  ;;  %s845_s10 = smov 94  }
  0x11   : > { %229 = vmatpush.msra.mxu0 %v195_v0  ;;  %775 = vmatpush.msra.mxu3 %v195_v0  ;;  %v190_v2 = vld [vmem:[%s180_s22] sm:$0xff]  ;;  %v191_v3 = vld [vmem:[%s180_s22 + $0x8] sm:$0xff]  ;;  %v192_v5 = vld [vmem:[%s180_s22 + $0x10] sm:$0xff]  ;;  %s846_s11 = smov 80   ;;  %s847_s12 = smov 92  }
  0x12   : > { %777 = vmatpush.msra.mxu2 %v197_v1  ;;  %758 = vmatmul.msk.f32.vlgmr.msra.gmra.mxu0 %vm198_vm0, %v190_v2  ;;  %v193_v6 = vld [vmem:[%s180_s22 + $0x18] sm:$0xff]  ;;  %v194_v7 = vld [vmem:[%s180_s22 + $0x20] sm:$0xf]  ;;  %s848_s13 = smov 91   ;;  %s849_s0 = smov 77  }
  0x13   : > { %759 = vmatmul.msk.f32.vlgmr.msra.gmra.mxu3 %vm198_vm0, %v191_v3  ;;  %769 = vmatmul.msk.f32.vlgmr.msra.gmra.mxu2 %vm198_vm0, %v191_v3  ;;  %s850_s16 = smov 79   ;;  %s851_s17 = smov 78  }
  0x14   : > { %776 = vmatpush.msra.mxu1 %v196_v4  ;;  %261 = vmatpush.msrb.mxu0 %v196_v4  ;;  %s852_s18 = smov 64   ;;  %s853_s19 = smov 76  }
  0x15   : > { %764 = vmatmul.msk.f32.vlgmr.msra.gmra.mxu1 %vm198_vm0, %v191_v3  ;;  %s854_s20 = smov 75   ;;  %s855_s21 = smov 61  }
  0x16   : > { %293 = vmatpush.msra.mxu0 %v197_v1  ;;  %s856_s22 = smov 63  }
  0x1a   : > { %763 = vmatmul.msk.f32.vlgmr.msrb.gmra.mxu0 %vm198_vm0, %v190_v2 }
  0x1b   : > { %760 = vmatmul.msk.f32.gmra.mxu3 %vm198_vm0, %v192_v5  ;;  %770 = vmatmul.msk.f32.gmra.mxu2 %vm198_vm0, %v192_v5 }
  0x1d   : > { %765 = vmatmul.msk.f32.gmra.mxu1 %vm198_vm0, %v192_v5 }
  0x22   : > { %768 = vmatmul.msk.f32.vlgmr.msra.gmra.mxu0 %vm198_vm0, %v190_v2 }
  0x23   : > { %761 = vmatmul.msk.f32.gmra.mxu3 %vm198_vm0, %v193_v6  ;;  %771 = vmatmul.msk.f32.gmra.mxu2 %vm198_vm0, %v193_v6 }
  0x25   : > { %766 = vmatmul.msk.f32.gmra.mxu1 %vm198_vm0, %v193_v6 }
  0x2b   : > { %762 = vmatmul.msk.f32.gmra.mxu3 %vm198_vm0, %v194_v7  ;;  %772 = vmatmul.msk.f32.gmra.mxu2 %vm198_vm0, %v194_v7 }
  0x2d   : > { %767 = vmatmul.msk.f32.gmra.mxu1 %vm198_vm0, %v194_v7  ;;  %vm483_vm0 = vcmask 752640  }
  0x8f   : > { %v231_v8 = vpop.f32.mrf.mxu0 }
  0x90   : > { %310 = vst [vmem:[#allocation2] sm:$0xff] %v231_v8 }
  0x92   : > { %v266_v9 = vpop.f32.mrf.mxu1 }
  0x93   : > { %314 = vst [vmem:[#allocation2 + $0x20] sm:$0xff] %v266_v9 }
  0x96   : > { %v234_v10 = vpop.f32.mrf.mxu3  ;;  %v298_v11 = vpop.f32.mrf.mxu2 }
  0x97   : > { %313 = vst [vmem:[#allocation2 + $0x18] sm:$0xff] %v234_v10  ;;  %v263_v12 = vpop.f32.mrf.mxu0 }
  0x98   : > { %315 = vst [vmem:[#allocation2 + $0x28] sm:$0xff] %v298_v11 }
  0x99   : > { %311 = vst [vmem:[#allocation2 + $0x8] sm:$0xff] %v263_v12 }
  0x9a   : > { %v269_v13 = vpop.f32.mrf.mxu1 }
  0x9b   : > { %317 = vst [vmem:[#allocation2 + $0x38] sm:$0xff] %v269_v13 }
  0x9e   : > { %v237_v17 = vpop.f32.mrf.mxu3  ;;  %v301_v19 = vpop.f32.mrf.mxu2 }
  0x9f   : > { %v418_v14 = vld [vmem:[#allocation2 + $0x1a] ss:$8 sm:$0x7]  ;;  %v408_v15 = vld [vmem:[#allocation2 + $0x19] ss:$8 sm:$0x7]  ;;  %v295_v16 = vpop.f32.mrf.mxu0 }
  0xa0   : > { %420 = vrot.lane.b32.xlu0 %v418_v14, %s831_s23  ;;  %410 = vrot.lane.b32.xlu2 %v408_v15, %s832_s24  ;;  %v398_v18 = vld [vmem:[#allocation2 + $0x18] ss:$8 sm:$0x7]  ;;  %312 = vst [vmem:[#allocation2 + $0x10] sm:$0xff] %v295_v16  ;;  %s857_s23 = smov 62   ;;  %s858_s24 = smov 48  }
  0xa1   : > { %400 = vrot.lane.b32.xlu1 %v398_v18, %s833_s25  ;;  %316 = vst [vmem:[#allocation2 + $0x30] sm:$0xff] %v237_v17  ;;  %v448_v20 = vld [vmem:[#allocation2 + $0x1d] ss:$8 sm:$0x7]  ;;  %s859_s25 = smov 60  }
  0xa2   : > { %318 = vst [vmem:[#allocation2 + $0x40] sm:$0xff] %v301_v19  ;;  %v438_v21 = vld [vmem:[#allocation2 + $0x1c] ss:$8 sm:$0x7]  ;;  %v272_v24 = vpop.f32.mrf.mxu1 }
  0xa3   : > { %v428_v22 = vld [vmem:[#allocation2 + $0x1b] ss:$8 sm:$0x7]  ;;  %320 = vst [vmem:[#allocation2 + $0x50] sm:$0xff] %v272_v24 }
  0xa4   : > { %v468_v32 = vld [vmem:[#allocation2 + $0x1f] ss:$8 sm:$0x7]  ;;  %v458_v34 = vld [vmem:[#allocation2 + $0x1e] ss:$8 sm:$0x7] }
  0xa5   : > { %v325_v9 = vld [vmem:[#allocation2] ss:$8 sm:$0x3] }
  0xa6   : > { %v240_v23 = vpop.f32.mrf.mxu3  ;;  %v304_v25 = vpop.f32.mrf.mxu2 }
  0xa7   : > { %319 = vst [vmem:[#allocation2 + $0x48] sm:$0xff] %v240_v23  ;;  %v368_v26 = vld [vmem:[#allocation2 + $0x5] ss:$8 sm:$0x7] }
  0xa8   : > { %450 = vrot.lane.b32.xlu0 %v448_v20, %s834_s26  ;;  %440 = vrot.lane.b32.xlu2 %v438_v21, %s835_s27  ;;  %321 = vst [vmem:[#allocation2 + $0x58] sm:$0xff] %v304_v25  ;;  %v328_v27 = vld [vmem:[#allocation2 + $0x1] ss:$8 sm:$0x7]  ;;  %s860_s26 = smov 59   ;;  %s861_s27 = smov 45  }
  0xa9   : > { %430 = vrot.lane.b32.xlu1 %v428_v22, %s836_s28  ;;  %v348_v28 = vld [vmem:[#allocation2 + $0x3] ss:$8 sm:$0x7]  ;;  %v378_v29 = vld [vmem:[#allocation2 + $0x6] ss:$8 sm:$0x7] }
  0xaa   : > { %v338_v30 = vld [vmem:[#allocation2 + $0x2] ss:$8 sm:$0x7]  ;;  %v358_v31 = vld [vmem:[#allocation2 + $0x4] ss:$8 sm:$0x7]  ;;  %v275_v36 = vpop.f32.mrf.mxu1 }
  0xab   : > { %v388_v33 = vld [vmem:[#allocation2 + $0x7] ss:$8 sm:$0x7]  ;;  %323 = vst [vmem:[#allocation2 + $0x68] sm:$0xf] %v275_v36  ;;  %s862_s28 = smov 47  }
  0xac   : > { %v498_v38 = vld [vmem:[#allocation2 + $0x32] ss:$8 sm:$0x7]  ;;  %v478_v39 = vld [vmem:[#allocation2 + $0x30] ss:$8 sm:$0x7] }
  0xad   : > { %v488_v40 = vld [vmem:[#allocation2 + $0x31] ss:$8 sm:$0x7]  ;;  %v528_v41 = vld [vmem:[#allocation2 + $0x35] ss:$8 sm:$0x7] }
  0xae   : > { %v243_v35 = vpop.f32.mrf.mxu3  ;;  %v307_v37 = vpop.f32.mrf.mxu2  ;;  %v508_v42 = vld [vmem:[#allocation2 + $0x33] ss:$8 sm:$0x7]  ;;  %v518_v43 = vld [vmem:[#allocation2 + $0x34] ss:$8 sm:$0x7] }
  0xaf   : > { %322 = vst [vmem:[#allocation2 + $0x60] sm:$0xf] %v243_v35  ;;  %v558_v44 = vld [vmem:[#allocation2 + $0x48] ss:$8 sm:$0x7] }
  0xb0   : > { %370 = vrot.lane.b32.xlu2 %v368_v26, %s837_s29  ;;  %330 = vrot.lane.b32.xlu0 %v328_v27, %s838_s30  ;;  %324 = vst [vmem:[#allocation2 + $0x70] sm:$0xf] %v307_v37  ;;  %v538_v45 = vld [vmem:[#allocation2 + $0x36] ss:$8 sm:$0x7]  ;;  %s863_s29 = smov 46  }
  0xb1   : > { %350 = vrot.lane.b32.xlu1 %v348_v28, %s839_s4  ;;  %v548_v46 = vld [vmem:[#allocation2 + $0x37] ss:$8 sm:$0x7]  ;;  %v588_v47 = vld [vmem:[#allocation2 + $0x4b] ss:$8 sm:$0x7] }
  0xb2   : > { %v568_v48 = vld [vmem:[#allocation2 + $0x49] ss:$8 sm:$0x7]  ;;  %v578_v49 = vld [vmem:[#allocation2 + $0x4a] ss:$8 sm:$0x7] }
  0xb3   : > { %v618_v50 = vld [vmem:[#allocation2 + $0x4e] ss:$8 sm:$0x7]  ;;  %v598_v51 = vld [vmem:[#allocation2 + $0x4c] ss:$8 sm:$0x7] }
  0xb4   : > { %v608_v52 = vld [vmem:[#allocation2 + $0x4d] ss:$8 sm:$0x7]  ;;  %v628_v55 = vld [vmem:[#allocation2 + $0x4f] ss:$8 sm:$0x7] }
  0xb5   : > { %s864_s30 = smov 44   ;;  %s865_s4 = smov 43  }
  0xb7   : > { %v648_v53 = vld [vmem:[#allocation2 + $0x61] ss:$8 sm:$0x7]  ;;  %v638_v54 = vld [vmem:[#allocation2 + $0x60] ss:$8 sm:$0x7] }
  0xb8   : > { %380 = vrot.lane.b32.xlu2 %v378_v29, %s840_s5  ;;  %340 = vrot.lane.b32.xlu0 %v338_v30, %s841_s6  ;;  %v658_v56 = vld [vmem:[#allocation2 + $0x62] ss:$8 sm:$0x7]  ;;  %v668_v57 = vld [vmem:[#allocation2 + $0x63] ss:$8 sm:$0x7] }
  0xb9   : > { %360 = vrot.lane.b32.xlu1 %v358_v31, %s842_s7  ;;  %s677_s5 = sld [smem:[#allocation3]]  ;;  %s757_s6 = sshll.u32 %s950_s15, 1 }
  0xc0   : > { %470 = vrot.lane.b32.xlu2 %v468_v32, %s843_s8  ;;  %390 = vrot.lane.b32.xlu0 %v388_v33, %s844_s9  ;;  %s189_s9 = scalar_lea.vmem %s948_s3, %s757_s6 }
  0xc1   : > { %460 = vrot.lane.b32.xlu1 %v458_v34, %s845_s10 }
  0xc8   : > { %500 = vrot.lane.b32.xlu2 %v498_v38, %s846_s11  ;;  %480 = vrot.lane.b32.xlu0 %v478_v39, %s847_s12 }
  0xc9   : > { %490 = vrot.lane.b32.xlu1 %v488_v40, %s848_s13 }
  0xd0   : > { %530 = vrot.lane.b32.xlu2 %v528_v41, %s849_s0  ;;  %510 = vrot.lane.b32.xlu0 %v508_v42, %s850_s16 }
  0xd1   : > { %520 = vrot.lane.b32.xlu1 %v518_v43, %s851_s17 }
  0xd8   : > { %560 = vrot.lane.b32.xlu2 %v558_v44, %s852_s18  ;;  %540 = vrot.lane.b32.xlu0 %v538_v45, %s853_s19 }
  0xd9   : > { %550 = vrot.lane.b32.xlu1 %v548_v46, %s854_s20 }
  0xe0   : > { %590 = vrot.lane.b32.xlu2 %v588_v47, %s855_s21  ;;  %570 = vrot.lane.b32.xlu0 %v568_v48, %s856_s22 }
  0xe1   : > { %580 = vrot.lane.b32.xlu1 %v578_v49, %s857_s23 }
  0xe8   : > { %620 = vrot.lane.b32.xlu2 %v618_v50, %s858_s24  ;;  %600 = vrot.lane.b32.xlu0 %v598_v51, %s859_s25 }
  0xe9   : > { %610 = vrot.lane.b32.xlu1 %v608_v52, %s860_s26 }
  0xf0   : > { %650 = vrot.lane.b32.xlu2 %v648_v53, %s861_s27  ;;  %630 = vrot.lane.b32.xlu0 %v628_v55, %s862_s28 }
  0xf1   : > { %640 = vrot.lane.b32.xlu1 %v638_v54, %s863_s29 }
  0xf8   : > { %660 = vrot.lane.b32.xlu0 %v658_v56, %s864_s30 }
  0xf9   : > { %670 = vrot.lane.b32.xlu1 %v668_v57, %s865_s4 }
  0xfa   : > { %v411_v58 = vpop.permute.xlu2 %410 }
  0xfb   : > { %v412_v31 = vrot.slane %v411_v58, 1 }
  0xfd   : > { %v414_v38 = vsel %vm413_vm9, %v411_v58, %v412_v31  ;;  %vm573_vm9 = vcmask 515072  }
 0x102   : > { %v922_v59 = vpop.permute.xlu2 %440 }
 0x103   : > { %v442_v43 = vrot.slane %v922_v59, 1 }
 0x105   : > { %v444_v49 = vsel %vm443_vm12, %v922_v59, %v442_v43  ;;  %vm603_vm12 = vcmask 490496  }
 0x10a   : > { %v371_v62 = vpop.permute.xlu2 %370 }
 0x10b   : > { %v372_v16 = vrot.slane %v371_v62, 1 }
 0x10d   : > { %v374_v24 = vsel %vm373_vm5, %v371_v62, %v372_v16  ;;  %vm533_vm5 = vcmask 629760  }
 0x112   : > { %v421_v60 = vpop.permute.xlu0 %420  ;;  %v381_v1 = vpop.permute.xlu2 %380 }
 0x113   : > { %v401_v61 = vpop.permute.xlu1 %400  ;;  %v382_v19 = vrot.slane %v381_v1, 1  ;;  %v422_v34 = vrot.slane %v421_v60, 1 }
 0x114   : > { %v402_v28 = vrot.slane %v401_v61, 1 }
 0x115   : > { %v384_v29 = vsel %vm383_vm6, %v381_v1, %v382_v19  ;;  %v424_v44 = vsel %vm423_vm10, %v421_v60, %v422_v34  ;;  %vm543_vm6 = vcmask 621568   ;;  %vm583_vm10 = vcmask 506880  }
 0x116   : > { %v404_v35 = vsel %vm403_vm8, %v401_v61, %v402_v28  ;;  %vm563_vm8 = vcmask 523264  }
 0x11a   : > { %v924_v63 = vpop.permute.xlu0 %450  ;;  %v926_v5 = vpop.permute.xlu2 %470 }
 0x11b   : > { %v431_v0 = vpop.permute.xlu1 %430  ;;  %v452_v46 = vrot.slane %v924_v63, 1  ;;  %v472_v54 = vrot.slane %v926_v5, 1 }
 0x11c   : > { %v432_v39 = vrot.slane %v431_v0, 1 }
 0x11d   : > { %v454_v53 = vsel %vm453_vm13, %v924_v63, %v452_v46  ;;  %v474_v62 = vsel %vm473_vm15, %v926_v5, %v472_v54  ;;  %vm613_vm13 = vcmask 482304   ;;  %vm633_vm15 = vcmask 384000  }
 0x11e   : > { %v434_v47 = vsel %vm433_vm11, %v431_v0, %v432_v39  ;;  %vm593_vm11 = vcmask 498688  }
 0x122   : > { %v331_v2 = vpop.permute.xlu0 %330  ;;  %v928_v21 = vpop.permute.xlu2 %500 }
 0x123   : > { %v351_v3 = vpop.permute.xlu1 %350  ;;  %v332_v4 = vrot.slane %v331_v2, 1  ;;  %v502_v1 = vrot.slane %v928_v21, 1 }
 0x124   : > { %v352_v8 = vrot.slane %v351_v3, 1 }
 0x125   : > { %v334_v6 = vsel %vm333_vm1, %v331_v2, %v332_v4  ;;  %vm493_vm1 = vcmask 744448  }
 0x126   : > { %v336_v12 = vadd.f32 %v334_v6, %v325_v9  ;;  %v354_v17 = vsel %vm353_vm3, %v351_v3, %v352_v8  ;;  %vm513_vm3 = vcmask 646144  }
 0x12a   : > { %v341_v7 = vpop.permute.xlu0 %340  ;;  %v531_v41 = vpop.permute.xlu2 %530 }
 0x12b   : > { %v361_v10 = vpop.permute.xlu1 %360  ;;  %v342_v11 = vrot.slane %v341_v7, 1  ;;  %v532_v5 = vrot.slane %v531_v41, 1 }
 0x12c   : > { %v362_v13 = vrot.slane %v361_v10, 1 }
 0x12d   : > { %v344_v14 = vsel %vm343_vm2, %v341_v7, %v342_v11  ;;  %vm503_vm2 = vcmask 654336   ;;  %v534_v19 = vsel %vm533_vm5, %v531_v41, %v532_v5 }
 0x12e   : > { %v346_v15 = vadd.f32 %v344_v14, %v336_v12  ;;  %v364_v20 = vsel %vm363_vm4, %v361_v10, %v362_v13  ;;  %v504_v9 = vsel %vm503_vm2, %v928_v21, %v502_v1  ;;  %vm523_vm4 = vcmask 637952  }
 0x12f   : > { %vm663_vm2 = vcmask 359424  }
 0x130   : > { %v356_v18 = vadd.f32 %v354_v17, %v346_v15 }
 0x132   : > { %v366_v22 = vadd.f32 %v364_v20, %v356_v18  ;;  %v391_v23 = vpop.permute.xlu0 %390  ;;  %v561_v60 = vpop.permute.xlu2 %560 }
 0x133   : > { %v461_v25 = vpop.permute.xlu1 %460  ;;  %v392_v26 = vrot.slane %v391_v23, 1 }
 0x134   : > { %v376_v27 = vadd.f32 %v374_v24, %v366_v22  ;;  %v462_v50 = vrot.slane %v461_v25, 1  ;;  %v562_v24 = vrot.slane %v561_v60, 1 }
 0x135   : > { %v394_v32 = vsel %vm393_vm7, %v391_v23, %v392_v26  ;;  %vm553_vm7 = vcmask 613376  }
 0x136   : > { %v386_v30 = vadd.f32 %v384_v29, %v376_v27  ;;  %v464_v57 = vsel %vm463_vm14, %v461_v25, %v462_v50  ;;  %v564_v29 = vsel %vm563_vm8, %v561_v60, %v562_v24  ;;  %vm623_vm14 = vcmask 392192  }
 0x138   : > { %v396_v33 = vadd.f32 %v394_v32, %v386_v30 }
 0x13a   : > { %v406_v36 = vadd.f32 %v404_v35, %v396_v33  ;;  %v481_v37 = vpop.permute.xlu0 %480  ;;  %v591_v13 = vpop.permute.xlu2 %590 }
 0x13b   : > { %v491_v40 = vpop.permute.xlu1 %490  ;;  %v482_v58 = vrot.slane %v481_v37, 1  ;;  %v592_v34 = vrot.slane %v591_v13, 1 }
 0x13c   : > { %v416_v42 = vadd.f32 %v414_v38, %v406_v36  ;;  %v492_v0 = vrot.slane %v491_v40, 1 }
 0x13d   : > { %v484_v2 = vsel %vm483_vm0, %v481_v37, %v482_v58  ;;  %v594_v41 = vsel %vm593_vm11, %v591_v13, %v592_v34  ;;  %vm643_vm0 = vcmask 375808  }
 0x13e   : > { %v426_v45 = vadd.f32 %v424_v44, %v416_v42  ;;  %v494_v4 = vsel %vm493_vm1, %v491_v40, %v492_v0  ;;  %vm653_vm1 = vcmask 367616  }
 0x140   : > { %v436_v48 = vadd.f32 %v434_v47, %v426_v45 }
 0x142   : > { %v446_v51 = vadd.f32 %v444_v49, %v436_v48  ;;  %v511_v52 = vpop.permute.xlu0 %510  ;;  %v621_v31 = vpop.permute.xlu2 %620 }
 0x143   : > { %v521_v55 = vpop.permute.xlu1 %520  ;;  %v512_v6 = vrot.slane %v511_v52, 1  ;;  %v622_v44 = vrot.slane %v621_v31, 1 }
 0x144   : > { %v456_v56 = vadd.f32 %v454_v53, %v446_v51  ;;  %v522_v10 = vrot.slane %v521_v55, 1 }
 0x145   : > { %v514_v12 = vsel %vm513_vm3, %v511_v52, %v512_v6  ;;  %v624_v53 = vsel %vm623_vm14, %v621_v31, %v622_v44  ;;  %vm673_vm3 = vcmask 351232  }
 0x146   : > { %v466_v61 = vadd.f32 %v464_v57, %v456_v56  ;;  %v524_v15 = vsel %vm523_vm4, %v521_v55, %v522_v10 }
 0x148   : > { %v476_v59 = vadd.f32 %v474_v62, %v466_v61 }
 0x14a   : > { %v486_v63 = vadd.f32 %v484_v2, %v476_v59  ;;  %v541_v3 = vpop.permute.xlu0 %540  ;;  %v651_v51 = vpop.permute.xlu2 %650 }
 0x14b   : > { %v551_v7 = vpop.permute.xlu1 %550  ;;  %v542_v16 = vrot.slane %v541_v3, 1  ;;  %v652_v56 = vrot.slane %v651_v51, 1 }
 0x14c   : > { %v496_v8 = vadd.f32 %v494_v4, %v486_v63  ;;  %v552_v20 = vrot.slane %v551_v7, 1 }
 0x14d   : > { %v544_v21 = vsel %vm543_vm6, %v541_v3, %v542_v16  ;;  %v654_v0 = vsel %vm653_vm1, %v651_v51, %v652_v56  ;;  %v680_v3 = vlaneseq }
 0x14e   : > { %v506_v11 = vadd.f32 %v504_v9, %v496_v8  ;;  %v554_v26 = vsel %vm553_vm7, %v551_v7, %v552_v20  ;;  %v678_v8 = vstv %s677_s5 }
 0x14f   : > { %vm682_vm4 = vcmp.lt.s32.totalorder %v680_v3, 256 }
 0x150   : > { %v516_v14 = vadd.f32 %v514_v12, %v506_v11 }
 0x152   : > { %v526_v17 = vadd.f32 %v524_v15, %v516_v14  ;;  %v571_v18 = vpop.permute.xlu0 %570 }
 0x153   : > { %v581_v22 = vpop.permute.xlu1 %580  ;;  %v572_v27 = vrot.slane %v571_v18, 1 }
 0x154   : > { %v536_v23 = vadd.f32 %v534_v19, %v526_v17  ;;  %v582_v30 = vrot.slane %v581_v22, 1 }
 0x155   : > { %v574_v35 = vsel %vm573_vm9, %v571_v18, %v572_v27 }
 0x156   : > { %v546_v25 = vadd.f32 %v544_v21, %v536_v23  ;;  %v584_v38 = vsel %vm583_vm10, %v581_v22, %v582_v30 }
 0x158   : > { %v556_v28 = vadd.f32 %v554_v26, %v546_v25 }
 0x15a   : > { %v566_v32 = vadd.f32 %v564_v29, %v556_v28  ;;  %v601_v33 = vpop.permute.xlu0 %600 }
 0x15b   : > { %v611_v36 = vpop.permute.xlu1 %610  ;;  %v602_v39 = vrot.slane %v601_v33, 1 }
 0x15c   : > { %v576_v37 = vadd.f32 %v574_v35, %v566_v32  ;;  %v612_v42 = vrot.slane %v611_v36, 1 }
 0x15d   : > { %v604_v45 = vsel %vm603_vm12, %v601_v33, %v602_v39 }
 0x15e   : > { %v586_v40 = vadd.f32 %v584_v38, %v576_v37  ;;  %v614_v48 = vsel %vm613_vm13, %v611_v36, %v612_v42 }
 0x160   : > { %v596_v43 = vadd.f32 %v594_v41, %v586_v40 }
 0x162   : > { %v606_v46 = vadd.f32 %v604_v45, %v596_v43  ;;  %v631_v47 = vpop.permute.xlu0 %630 }
 0x163   : > { %v641_v49 = vpop.permute.xlu1 %640  ;;  %v632_v50 = vrot.slane %v631_v47, 1 }
 0x164   : > { %v616_v52 = vadd.f32 %v614_v48, %v606_v46  ;;  %v642_v54 = vrot.slane %v641_v49, 1 }
 0x165   : > { %v634_v57 = vsel %vm633_vm15, %v631_v47, %v632_v50 }
 0x166   : > { %v626_v55 = vadd.f32 %v624_v53, %v616_v52  ;;  %v644_v60 = vsel %vm643_vm0, %v641_v49, %v642_v54 }
 0x168   : > { %v636_v58 = vadd.f32 %v634_v57, %v626_v55 }
 0x16a   : > { %v646_v61 = vadd.f32 %v644_v60, %v636_v58  ;;  %v661_v62 = vpop.permute.xlu0 %660 }
 0x16b   : > { %v671_v59 = vpop.permute.xlu1 %670  ;;  %v662_v1 = vrot.slane %v661_v62, 1 }
 0x16c   : > { %v672_v2 = vrot.slane %v671_v59, 1  ;;  %v656_v63 = vadd.f32 %v654_v0, %v646_v61 }
 0x16d   : > { %v664_v4 = vsel %vm663_vm2, %v661_v62, %v662_v1 }
 0x16e   : > { %v666_v6 = vadd.f32 %v664_v4, %v656_v63  ;;  %v674_v7 = vsel %vm673_vm3, %v671_v59, %v672_v2 }
 0x170   : > { %v676_v9 = vadd.f32 %v674_v7, %v666_v6 }
 0x172   : > { %v679_v10 = vmul.f32 %v678_v8, %v676_v9 }
 0x174   : > { %684 = vst.msk [vmem:[%s189_s9] sm:$0x3] %vm682_vm4, %v679_v10 }
 0x175 PF: > { %s14_s14 = sadd.s32 1, %s829_s14  }
 0x176   : > { %p11_p4 = scmp.ge.s32.totalorder %s14_s14, 4  }
 0x178   :  { %13 = sbr.rel (!%p11_p4) target bundleno = 2 (0x2), region = 100 }

</bundles_post_ra>
